<compile_context>
chip_gen: v7x
topology: tpu7x:2x2x1
jax: 0.10.0
libtpu: 0.0.40
codegen_flags: <defaults>
</compile_context>

<pallas_src>
import jax
import jax.numpy as jnp
from jax.experimental import pallas as pl
from jax.experimental.pallas import tpu as pltpu

LANE = 128  # lane width


# --------------------------------------------------------------------------
# Kernel 1: SAGEConv-1 (all nodes, row-blocked) + weight side of SAGEConv-2.
#   agg_i = (A_cnt[i] @ X) * inv_deg[i]                 (f32 normalization)
#   h1_i  = relu([agg_i | X_i] @ [W1l; W1r] + b1)       (K = 2*FP fused)
#   z_i   = h1_i @ W2l            -> bf16 output (fed to the A @ z pass)
#   s_i   = h1_i @ W2r + b2       -> f32 output  (direct additive term)
# --------------------------------------------------------------------------
def sage_layer1_kernel(a_ref, invd_ref, x_ref, w1_ref, b1_ref, w2_ref, b2_ref,
                       z_ref, s_ref):
    i = pl.program_id(0)
    tm = z_ref.shape[0]
    fp = z_ref.shape[1]

    a_blk = a_ref[...]                        # (TM, NP) bf16, exact int counts
    x_all = x_ref[...]                        # (NP, FP) bf16

    # Mean aggregation: bf16 MXU pass, f32 accumulation, f32 1/deg scaling.
    agg = jnp.dot(a_blk, x_all, preferred_element_type=jnp.float32)
    agg = agg * invd_ref[...]                 # (TM, FP) f32

    # Self features for this row block, sliced from the resident X.
    r0 = pl.multiple_of(i * tm, tm)
    x_blk = x_ref[pl.ds(r0, tm), :]           # (TM, FP) bf16

    # Layer 1: single K = 2*FP matmul against the pre-concatenated weights.
    cat = jnp.concatenate([agg.astype(jnp.bfloat16), x_blk], axis=-1)
    h1 = jnp.dot(cat, w1_ref[...], preferred_element_type=jnp.float32)
    h1 = jnp.maximum(h1 + b1_ref[...], 0.0).astype(jnp.bfloat16)   # (TM, HP)

    # Layer-2 weight side, fused: [z | s_pre] = h1 @ [W2l | W2r].
    zs = jnp.dot(h1, w2_ref[...], preferred_element_type=jnp.float32)  # (TM, 2*FP)
    z_ref[...] = zs[:, :fp].astype(jnp.bfloat16)
    s_ref[...] = zs[:, fp:] + b2_ref[...]


# --------------------------------------------------------------------------
# Kernel 2: aggregation side of SAGEConv-2 (row-blocked).
#   out_i = relu( (A_cnt[i] @ z) * inv_deg[i] + s_i )
# --------------------------------------------------------------------------
def sage_layer2_kernel(a_ref, invd_ref, z_ref, s_ref, out_ref):
    agg = jnp.dot(a_ref[...], z_ref[...], preferred_element_type=jnp.float32)
    agg = agg * invd_ref[...]
    out_ref[...] = jnp.maximum(agg + s_ref[...], 0.0).astype(out_ref.dtype)


def _pad2(m, rows, cols):
    return jnp.pad(m, ((0, rows - m.shape[0]), (0, cols - m.shape[1])))


def init_params(key, in_channels, out_channels):
    """Deterministic glorot-uniform init for the two SAGEConv layers."""
    def glorot(k, fan_in, fan_out):
        lim = jnp.sqrt(6.0 / (fan_in + fan_out))
        return jax.random.uniform(k, (fan_in, fan_out), jnp.float32, -lim, lim)

    k1, k2, k3, k4 = jax.random.split(key, 4)
    w1l = glorot(k1, in_channels, out_channels)       # conv1: in -> out
    w1r = glorot(k2, in_channels, out_channels)
    b1 = jnp.zeros((1, out_channels), jnp.float32)
    w2l = glorot(k3, out_channels, in_channels)       # conv2: out -> in
    w2r = glorot(k4, out_channels, in_channels)
    b2 = jnp.zeros((1, in_channels), jnp.float32)
    return (w1l, w1r, b1, w2l, w2r, b2)


def graph_encoder(x, edge_index, params):
    """x: (N, in_channels) float32; edge_index: (2, E) int32 [src; dst]."""
    N, fin = x.shape
    w1l, w1r, b1, w2l, w2r, b2 = params
    hid = w1l.shape[1]

    # Padded, lane-dense sizes.
    NP = max(LANE, pl.cdiv(N, LANE) * LANE)
    FP = max(LANE, pl.cdiv(fin, LANE) * LANE)
    HP = max(LANE, pl.cdiv(hid, LANE) * LANE)
    TM = 256 if NP % 256 == 0 else LANE     # larger row tile once N >= 256

    # Glue: dense adjacency COUNTS (unnormalized); the 1/deg mean scaling is
    # done in f32 inside the kernels, so bf16 only ever holds exact integers.
    # TODO(synk): for large sparse graphs, replace the dense O(N^2) adjacency
    # with a CSR / padded-neighbor-list gather via PrefetchScalarGridSpec so
    # aggregation is O(E*F) instead of O(N^2*F).
    src, dst = edge_index[0], edge_index[1]
    adj = jnp.zeros((N, N), jnp.float32).at[dst, src].add(1.0)
    deg = adj.sum(axis=1, keepdims=True)
    inv_deg = 1.0 / jnp.maximum(deg, 1.0)

    a_p = _pad2(adj, NP, NP).astype(jnp.bfloat16)     # exact small ints
    invd_p = _pad2(inv_deg, NP, 1)                    # f32
    x_p = _pad2(x, NP, FP).astype(jnp.bfloat16)

    # Pre-concatenated weights for the K=2*FP fused matmuls.
    w1_cat = jnp.concatenate(
        [_pad2(w1l, FP, HP), _pad2(w1r, FP, HP)], axis=0).astype(jnp.bfloat16)
    b1_p = _pad2(b1, 1, HP)
    w2_cat = jnp.concatenate(
        [_pad2(w2l, HP, FP), _pad2(w2r, HP, FP)], axis=1).astype(jnp.bfloat16)
    b2_p = _pad2(b2, 1, FP)

    grid = (NP // TM,)
    cparams = pltpu.CompilerParams(
        dimension_semantics=("parallel",),
        # Budgeted for v7x (64 MiB physical): 2x A slab + resident X/weights
        # + double-buffered outputs stays well under this at these tilings.
        vmem_limit_bytes=48 * 1024 * 1024,
    )

    def row_blk(shape):
        return pl.BlockSpec(shape, lambda i: (i, 0))

    def resident(shape):
        # Constant block index -> DMA'd once, stays resident across steps.
        return pl.BlockSpec(shape, lambda i: (0, 0))

    # ---- call 1: layer 1 + layer-2 weight side, each node row computed once.
    z, s = pl.pallas_call(
        sage_layer1_kernel,
        out_shape=(jax.ShapeDtypeStruct((NP, FP), jnp.bfloat16),   # z = h1 @ W2l
                   jax.ShapeDtypeStruct((NP, FP), jnp.float32)),   # s = h1 @ W2r + b2
        grid=grid,
        in_specs=[
            row_blk((TM, NP)),        # A counts, streamed row slab
            row_blk((TM, 1)),         # 1/deg (f32)
            resident((NP, FP)),       # X
            resident((2 * FP, HP)),   # [W1l; W1r]
            resident((1, HP)),        # b1
            resident((HP, 2 * FP)),   # [W2l | W2r]
            resident((1, FP)),        # b2
        ],
        out_specs=(row_blk((TM, FP)), row_blk((TM, FP))),
        compiler_params=cparams,
    )(a_p, invd_p, x_p, w1_cat, b1_p, w2_cat, b2_p)

    # ---- call 2: layer-2 aggregation (A streamed again, z resident).
    out = pl.pallas_call(
        sage_layer2_kernel,
        out_shape=jax.ShapeDtypeStruct((NP, FP), jnp.bfloat16),
        grid=grid,
        in_specs=[
            row_blk((TM, NP)),        # A counts, streamed row slab
            row_blk((TM, 1)),         # 1/deg (f32)
            resident((NP, FP)),       # z (all nodes)
            row_blk((TM, FP)),        # s (row block)
        ],
        out_specs=row_blk((TM, FP)),
        compiler_params=cparams,
    )(a_p, invd_p, z, s)

    # Slice the valid block and restore the module's f32 output dtype.
    return out[:N, :fin].astype(jnp.float32)


def reference_forward(x, edge_index, params):
    """Pure-JAX f32 reference (original module math) for a sanity check."""
    N = x.shape[0]
    src, dst = edge_index[0], edge_index[1]
    adj = jnp.zeros((N, N), jnp.float32).at[dst, src].add(1.0)
    adj = adj / jnp.maximum(adj.sum(axis=1, keepdims=True), 1.0)
    w1l, w1r, b1, w2l, w2r, b2 = params
    h1 = jnp.maximum(adj @ x @ w1l + x @ w1r + b1, 0.0)
    h2 = jnp.maximum(adj @ h1 @ w2l + h1 @ w2r + b2, 0.0)
    return h2


if __name__ == "__main__":
    key = jax.random.PRNGKey(0)
    k_x, k_e, k_p = jax.random.split(key, 3)

    N = 16               # number of graph nodes
    in_channels = 8
    out_channels = 16
    E = 40               # number of directed edges

    x = jax.random.normal(k_x, (N, in_channels), jnp.float32)
    edge_index = jax.random.randint(k_e, (2, E), 0, N, jnp.int32)

    params = init_params(k_p, in_channels, out_channels)

    out = graph_encoder(x, edge_index, params)
    out = jax.block_until_ready(out)

    ref = reference_forward(x, edge_index, params)
    assert out.shape == (N, in_channels)
    # bf16 operands (f32 accumulation) -> loosened tolerance vs. f32 reference.
    assert jnp.allclose(out, ref, atol=5e-2, rtol=5e-2), (
        float(jnp.max(jnp.abs(out - ref))))

    print("KERNEL_OK")
</pallas_src>

<mosaic_0001>
module attributes {stable_mosaic.version = 11 : i64} {
  func.func @sage_layer1_kernel(%arg0: i32, %arg1: memref<128x128xbf16, #tpu.memory_space<vmem>>, %arg2: memref<128x1xf32, #tpu.memory_space<vmem>>, %arg3: memref<128x128xbf16, #tpu.memory_space<vmem>>, %arg4: memref<256x128xbf16, #tpu.memory_space<vmem>>, %arg5: memref<1x128xf32, #tpu.memory_space<vmem>>, %arg6: memref<128x256xbf16, #tpu.memory_space<vmem>>, %arg7: memref<1x128xf32, #tpu.memory_space<vmem>>, %arg8: memref<128x128xbf16, #tpu.memory_space<vmem>>, %arg9: memref<128x128xf32, #tpu.memory_space<vmem>>) attributes {dimension_semantics = [#tpu.dimension_semantics<parallel>], iteration_bounds = array<i64: 1>, scalar_prefetch = 0 : i64, scratch_operands = 0 : i64, tpu.core_type = #tpu.core_type<tc>, window_params = [{transform_indices = @transform_0, window_bounds = array<i64: 128, 128>}, {transform_indices = @transform_1, window_bounds = array<i64: 128, 1>}, {pipeline_mode = #tpu.pipeline_mode<synchronous>, transform_indices = @transform_2, window_bounds = array<i64: 128, 128>}, {pipeline_mode = #tpu.pipeline_mode<synchronous>, transform_indices = @transform_3, window_bounds = array<i64: 256, 128>}, {pipeline_mode = #tpu.pipeline_mode<synchronous>, transform_indices = @transform_4, window_bounds = array<i64: 1, 128>}, {pipeline_mode = #tpu.pipeline_mode<synchronous>, transform_indices = @transform_5, window_bounds = array<i64: 128, 256>}, {pipeline_mode = #tpu.pipeline_mode<synchronous>, transform_indices = @transform_6, window_bounds = array<i64: 1, 128>}, {transform_indices = @transform_7, window_bounds = array<i64: 128, 128>}, {transform_indices = @transform_8, window_bounds = array<i64: 128, 128>}]} {
    %c0 = arith.constant 0 : index
    %c0_0 = arith.constant 0 : index
    %0 = vector.load %arg1[%c0, %c0_0] : memref<128x128xbf16, #tpu.memory_space<vmem>>, vector<128x128xbf16>
    %c0_1 = arith.constant 0 : index
    %c0_2 = arith.constant 0 : index
    %1 = vector.load %arg3[%c0_1, %c0_2] : memref<128x128xbf16, #tpu.memory_space<vmem>>, vector<128x128xbf16>
    %cst = arith.constant dense<0.000000e+00> : vector<128x128xf32>
    %2 = tpu.matmul %0, %1, %cst {dimension_numbers = #tpu.dot_dimension_numbers<[1], [0], [0], [1], [0, 0, 1, 1], [], []>} : vector<128x128xbf16>, vector<128x128xbf16>, vector<128x128xf32> -> vector<128x128xf32>
    %c0_3 = arith.constant 0 : index
    %c0_4 = arith.constant 0 : index
    %3 = vector.load %arg2[%c0_3, %c0_4] : memref<128x1xf32, #tpu.memory_space<vmem>>, vector<128x1xf32>
    %4 = vector.broadcast %3 : vector<128x1xf32> to vector<128x128xf32>
    %5 = arith.mulf %2, %4 : vector<128x128xf32>
    %c128_i32 = arith.constant 128 : i32
    %6 = arith.muli %arg0, %c128_i32 : i32
    %7 = tpu.assume_multiple %6, 128 : i32
    %8 = arith.index_cast %7 : i32 to index
    %c0_5 = arith.constant 0 : index
    %9 = vector.load %arg3[%8, %c0_5] : memref<128x128xbf16, #tpu.memory_space<vmem>>, vector<128x128xbf16>
    %10 = arith.truncf %5 : vector<128x128xf32> to vector<128x128xbf16>
    %11 = tpu.concatenate %10, %9 in 1 : vector<128x128xbf16>, vector<128x128xbf16> -> vector<128x256xbf16>
    %c0_6 = arith.constant 0 : index
    %c0_7 = arith.constant 0 : index
    %12 = vector.load %arg4[%c0_6, %c0_7] : memref<256x128xbf16, #tpu.memory_space<vmem>>, vector<256x128xbf16>
    %cst_8 = arith.constant dense<0.000000e+00> : vector<128x128xf32>
    %13 = tpu.matmul %11, %12, %cst_8 {dimension_numbers = #tpu.dot_dimension_numbers<[1], [0], [0], [1], [0, 0, 1, 1], [], []>} : vector<128x256xbf16>, vector<256x128xbf16>, vector<128x128xf32> -> vector<128x128xf32>
    %c0_9 = arith.constant 0 : index
    %c0_10 = arith.constant 0 : index
    %14 = vector.load %arg5[%c0_9, %c0_10] : memref<1x128xf32, #tpu.memory_space<vmem>>, vector<1x128xf32>
    %15 = vector.broadcast %14 : vector<1x128xf32> to vector<128x128xf32>
    %16 = arith.addf %13, %15 : vector<128x128xf32>
    %cst_11 = arith.constant 0.000000e+00 : f32
    %17 = vector.broadcast %cst_11 : f32 to vector<128x128xf32>
    %18 = arith.maximumf %16, %17 : vector<128x128xf32>
    %19 = arith.truncf %18 : vector<128x128xf32> to vector<128x128xbf16>
    %c0_12 = arith.constant 0 : index
    %c0_13 = arith.constant 0 : index
    %20 = vector.load %arg6[%c0_12, %c0_13] : memref<128x256xbf16, #tpu.memory_space<vmem>>, vector<128x256xbf16>
    %cst_14 = arith.constant dense<0.000000e+00> : vector<128x256xf32>
    %21 = tpu.matmul %19, %20, %cst_14 {dimension_numbers = #tpu.dot_dimension_numbers<[1], [0], [0], [1], [0, 0, 1, 1], [], []>} : vector<128x128xbf16>, vector<128x256xbf16>, vector<128x256xf32> -> vector<128x256xf32>
    %22 = vector.extract_strided_slice %21 {offsets = [0, 0], sizes = [128, 128], strides = [1, 1]} : vector<128x256xf32> to vector<128x128xf32>
    %23 = arith.truncf %22 : vector<128x128xf32> to vector<128x128xbf16>
    %c0_15 = arith.constant 0 : index
    %c0_16 = arith.constant 0 : index
    %24 = vector.load %arg8[%c0_15, %c0_16] : memref<128x128xbf16, #tpu.memory_space<vmem>>, vector<128x128xbf16>
    tpu.vector_store %arg8[%c0_15, %c0_16], %23 {strides = array<i32>} : memref<128x128xbf16, #tpu.memory_space<vmem>>, vector<128x128xbf16>,
    %25 = vector.extract_strided_slice %21 {offsets = [0, 128], sizes = [128, 128], strides = [1, 1]} : vector<128x256xf32> to vector<128x128xf32>
    %c0_17 = arith.constant 0 : index
    %c0_18 = arith.constant 0 : index
    %26 = vector.load %arg7[%c0_17, %c0_18] : memref<1x128xf32, #tpu.memory_space<vmem>>, vector<1x128xf32>
    %27 = vector.broadcast %26 : vector<1x128xf32> to vector<128x128xf32>
    %28 = arith.addf %25, %27 : vector<128x128xf32>
    %c0_19 = arith.constant 0 : index
    %c0_20 = arith.constant 0 : index
    %29 = vector.load %arg9[%c0_19, %c0_20] : memref<128x128xf32, #tpu.memory_space<vmem>>, vector<128x128xf32>
    tpu.vector_store %arg9[%c0_19, %c0_20], %28 {strides = array<i32>} : memref<128x128xf32, #tpu.memory_space<vmem>>, vector<128x128xf32>,
    return
  }
  func.func @transform_0(%arg0: i32) -> (i32, i32) {
    %c0_i32 = arith.constant 0 : i32
    %c0_i32_0 = arith.constant 0 : i32
    return %arg0, %c0_i32 : i32, i32
  }
  func.func @transform_1(%arg0: i32) -> (i32, i32) {
    %c0_i32 = arith.constant 0 : i32
    %c0_i32_0 = arith.constant 0 : i32
    return %arg0, %c0_i32 : i32, i32
  }
  func.func @transform_2(%arg0: i32) -> (i32, i32) {
    %c0_i32 = arith.constant 0 : i32
    %c0_i32_0 = arith.constant 0 : i32
    %c0_i32_1 = arith.constant 0 : i32
    return %c0_i32, %c0_i32_0 : i32, i32
  }
  func.func @transform_3(%arg0: i32) -> (i32, i32) {
    %c0_i32 = arith.constant 0 : i32
    %c0_i32_0 = arith.constant 0 : i32
    %c0_i32_1 = arith.constant 0 : i32
    return %c0_i32, %c0_i32_0 : i32, i32
  }
  func.func @transform_4(%arg0: i32) -> (i32, i32) {
    %c0_i32 = arith.constant 0 : i32
    %c0_i32_0 = arith.constant 0 : i32
    %c0_i32_1 = arith.constant 0 : i32
    return %c0_i32, %c0_i32_0 : i32, i32
  }
  func.func @transform_5(%arg0: i32) -> (i32, i32) {
    %c0_i32 = arith.constant 0 : i32
    %c0_i32_0 = arith.constant 0 : i32
    %c0_i32_1 = arith.constant 0 : i32
    return %c0_i32, %c0_i32_0 : i32, i32
  }
  func.func @transform_6(%arg0: i32) -> (i32, i32) {
    %c0_i32 = arith.constant 0 : i32
    %c0_i32_0 = arith.constant 0 : i32
    %c0_i32_1 = arith.constant 0 : i32
    return %c0_i32, %c0_i32_0 : i32, i32
  }
  func.func @transform_7(%arg0: i32) -> (i32, i32) {
    %c0_i32 = arith.constant 0 : i32
    %c0_i32_0 = arith.constant 0 : i32
    return %arg0, %c0_i32 : i32, i32
  }
  func.func @transform_8(%arg0: i32) -> (i32, i32) {
    %c0_i32 = arith.constant 0 : i32
    %c0_i32_0 = arith.constant 0 : i32
    return %arg0, %c0_i32 : i32, i32
  }
}

</mosaic_0001>

<bundles_post_ra>
// kernel: tpu_custom_call.1
= control target key start
LH: loop header
LB: loop body
LE: loop exit
PB: predicated region body
PF: predicated region fallthrough
CT: control target
= control target key end

     0   :  { %14 = vsyncpa [#allocation3], 0  ;;  %s1865_s0 = inlined_call_operand.hbm [shape: bf16[128,128], index: 0, kind: input, shape index: {}]   ;;  %s1866_s1 = inlined_call_operand.vmem [shape: f32[128,1], index: 1, kind: input, shape index: {}]   ;;  %s1867_s2 = inlined_call_operand.hbm [shape: bf16[128,128], index: 2, kind: input, shape index: {}]   ;;  %s1868_s3 = inlined_call_operand.vmem [shape: bf16[256,128], index: 3, kind: input, shape index: {}]   ;;  %s1869_s4 = inlined_call_operand.vmem [shape: f32[1,128], index: 4, kind: input, shape index: {}]   ;;  %s1870_s5 = inlined_call_operand.hbm [shape: bf16[128,256], index: 5, kind: input, shape index: {}]   ;;  %s1871_s6 = inlined_call_operand.vmem [shape: f32[1,128], index: 6, kind: input, shape index: {}]   ;;  %s1872_s7 = inlined_call_operand.hbm [shape: bf16[128,128], index: 7, kind: output, shape index: {0}]   ;;  %s1873_s8 = inlined_call_operand.hbm [shape: f32[128,128], index: 8, kind: output, shape index: {1}]  }
   0x1   :  { %15 = vsyncpa [#allocation6], 0 }
   0x2   :  { %16 = vsyncpa [#allocation4], 0 }
   0x3   :  { %17 = vsyncpa [#allocation10], 0  ;;  %s1565_s27 = smov [#allocation5]   ;;  %s1566_s29 = smov [#allocation2]  }
   0x4   :  { %s37_s28 = sshll.u32 %s1565_s27, 4  ;;  %s23_s30 = sshll.u32 %s1566_s29, 4  ;;  %s38_s28 = int_to_ptr.vmem [resolvable:$true] %s37_s28  ;;  %s1620_s30 = int_to_ptr.vmem [resolvable:$true] %s23_s30 }
   0x5   :  { %s1447_s11 = scalar_lea.hbm %s1867_s2, 1024 }
   0x6   :  { %p1448_p0 = scmp.ne.s32.totalorder %s1867_s2, %s1447_s11  ;;  %p1451_p1 = scmp.lt.u32.totalorder %s1447_s11, %s1867_s2 }
   0x8   :  { %p1453_p2 = pnand %p1451_p1, %p1448_p0 }
   0xa   :  { %1456 = shalt.err (!%p1453_p2)
}
   0xb   :  { %s1457_s16 = scalar_lea.vmem %s38_s28, 1024  ;;  %p1462_p4 = scmp.lt.s32.totalorder %s38_s28, %s38_s28 }
   0xc   :  { %p1458_p3 = scmp.ne.s32.totalorder %s38_s28, %s1457_s16  ;;  %p1463_p5 = scmp.lt.s32.totalorder %s1457_s16, %s1457_s16 }
   0xe   :  { %p1464_p6 = por %p1463_p5, %p1462_p4 }
  0x10   :  { %p1465_p7 = pnand %p1464_p6, %p1458_p3 }
  0x12   :  { %1468 = shalt.err (!%p1465_p7)
}
  0x13   :  { %s1567_s17 = smov 64   ;;  %s1568_s18 = smov 4  }
  0x14   :  { %43 = dma.hbm_to_vmem [thread:$0]  %s1867_s2, 1024, %s38_s28, [#allocation6], %s1567_s17, %s1567_s17, %s1568_s18  }
  0x15   :  { %s1469_s23 = scalar_lea.hbm %s1865_s0, 1024 }
  0x16   :  { %p1470_p8 = scmp.ne.s32.totalorder %s1865_s0, %s1469_s23  ;;  %p1473_p9 = scmp.lt.u32.totalorder %s1469_s23, %s1865_s0 }
  0x18   :  { %p1475_p10 = pnand %p1473_p9, %p1470_p8 }
  0x1a   :  { %1478 = shalt.err (!%p1475_p10)
}
  0x1b   :  { %s1479_s29 = scalar_lea.vmem %s1620_s30, 1024  ;;  %p1484_p12 = scmp.lt.s32.totalorder %s1620_s30, %s1620_s30 }
  0x1c   :  { %p1480_p11 = scmp.ne.s32.totalorder %s1620_s30, %s1479_s29  ;;  %p1485_p13 = scmp.lt.s32.totalorder %s1479_s29, %s1479_s29 }
  0x1e   :  { %p1486_p0 = por %p1485_p13, %p1484_p12 }
  0x20   :  { %p1487_p1 = pnand %p1486_p0, %p1480_p11 }
  0x22   :  { %1490 = shalt.err (!%p1487_p1)
}
  0x23   :  { %29 = dma.hbm_to_vmem [thread:$0]  %s1865_s0, 1024, %s1620_s30, [#allocation3], %s1567_s17, %s1567_s17, %s1568_s18  }
  0x24   :  { %s1569_s9 = smov [#allocation7]   ;;  %s1491_s13 = scalar_lea.hbm %s1870_s5, 2048 }
  0x25   :  { %s53_s10 = sshll.u32 %s1569_s9, 4  ;;  %p1492_p2 = scmp.ne.s32.totalorder %s1870_s5, %s1491_s13  ;;  %s54_s10 = int_to_ptr.vmem [resolvable:$true] %s53_s10 }
  0x26   :  { %p1495_p3 = scmp.lt.u32.totalorder %s1491_s13, %s1870_s5 }
  0x28   :  { %p1497_p4 = pnand %p1495_p3, %p1492_p2 }
  0x2a   :  { %1500 = shalt.err (!%p1497_p4)
}
  0x2b   :  { %s1501_s20 = scalar_lea.vmem %s54_s10, 2048  ;;  %p1506_p6 = scmp.lt.s32.totalorder %s54_s10, %s54_s10 }
  0x2c   :  { %p1502_p5 = scmp.ne.s32.totalorder %s54_s10, %s1501_s20  ;;  %p1507_p7 = scmp.lt.s32.totalorder %s1501_s20, %s1501_s20 }
  0x2e   :  { %p1508_p8 = por %p1507_p7, %p1506_p6 }
  0x30   :  { %p1509_p9 = pnand %p1508_p8, %p1502_p5 }
  0x32   :  { %1512 = shalt.err (!%p1509_p9)
}
  0x33   :  { %s1570_s0 = smov 128   ;;  %s1571_s30 = smov 8  }
  0x34   :  { %59 = dma.hbm_to_vmem [thread:$0]  %s1870_s5, 2048, %s54_s10, [#allocation6], %s1570_s0, %s1570_s0, %s1571_s30  }
  0x35   :  { %1557 = dma.done.wait [#allocation3], 1024  }
  0x36   :  { %1558 = vsyncadd [#allocation3], 4294966272 }
  0x37   :  { %1559 = dma.done.wait [#allocation6], 3072  }
  0x38   :  { %1560 = vsyncadd [#allocation6], 4294964224  ;;  %v1572_v0 = vmov 0   ;;  %v1383_v1 = vld [vmem:[#allocation5] sm:$0xff]   ;;  %v1384_v2 = vld [vmem:[#allocation5 + $0x8] sm:$0xff]   ;;  %s1574_s25 = smov [#allocation9]  }
  0x39   :  { %1381 = vset.pattern.permute.xlu0 %v1572_v0  ;;  %1382 = vset.pattern.permute.xlu1 %v1572_v0  ;;  %v1385_v3 = vld [vmem:[#allocation5 + $0x10] sm:$0xff]   ;;  %v1386_v4 = vld [vmem:[#allocation5 + $0x18] sm:$0xff]   ;;  %v1391_v5 = vld [vmem:[#allocation2] sm:$0xff]   ;;  %s1087_s26 = sshll.u32 %s1574_s25, 4  ;;  %s1828_s26 = int_to_ptr.vmem [resolvable:$true] %s1087_s26 }
  0x3a   :  { %1323 = vmatprep.subr.bf16.mxu0 %v1383_v1  ;;  %1339 = vmatprep.mubr.bf16.mxu0 %v1391_v5  ;;  %v1387_v6 = vld [vmem:[#allocation5 + $0x20] sm:$0xff]   ;;  %v1388_v7 = vld [vmem:[#allocation5 + $0x28] sm:$0xff]   ;;  %v299_v9 = vld [vmem:[%s1866_s1 + $0x10] sm:$0xff] }
  0x3b   :  { %1324 = vmatpush3.bf16.msra.mxu0 %v1383_v1  ;;  %v297_v8 = vld [vmem:[%s1866_s1] sm:$0xff]  ;;  %325 = vperm.xlu1 %1382, %v299_v9   ;;  %v298_v10 = vld [vmem:[%s1866_s1 + $0x8] sm:$0xff]  ;;  %v300_v11 = vld [vmem:[%s1866_s1 + $0x18] sm:$0xff] }
  0x3c   :  { %1325 = vmatprep.subr.bf16.mxu0 %v1384_v2  ;;  %315 = vperm.xlu0 %1381, %v297_v8   ;;  %v1389_v12 = vld [vmem:[#allocation5 + $0x30] sm:$0xff]   ;;  %v301_v13 = vld [vmem:[%s1866_s1 + $0x20] sm:$0xff]  ;;  %v302_v14 = vld [vmem:[%s1866_s1 + $0x28] sm:$0xff] }
  0x3d   :  { %v1390_v15 = vld [vmem:[#allocation5 + $0x38] sm:$0xff]   ;;  %v1399_v16 = vld [vmem:[%s1868_s3 + $0x40] sm:$0xff]   ;;  %v303_v18 = vld [vmem:[%s1866_s1 + $0x30] sm:$0xff] }
  0x3e   :  { %v1400_v17 = vld [vmem:[%s1868_s3] sm:$0xff]   ;;  %v304_v19 = vld [vmem:[%s1866_s1 + $0x38] sm:$0xff]  ;;  %1259 = vmatprep.subr.bf16.mxu1 %v1399_v16  ;;  %v1401_v20 = vld [vmem:[%s1868_s3 + $0x48] sm:$0xff]  }
  0x3f   :  { %1326 = vmatpush3.bf16.msra.mxu0 %v1384_v2  ;;  %330 = vperm.xlu1 %1382, %v300_v11   ;;  %v1402_v21 = vld [vmem:[%s1868_s3 + $0x8] sm:$0xff]   ;;  %v305_v23 = vld [vmem:[%s1866_s1 + $0x40] sm:$0xff]  ;;  %v1403_v25 = vld [vmem:[%s1868_s3 + $0x50] sm:$0xff]  }
  0x40   :  { %1327 = vmatprep.subr.bf16.mxu0 %v1385_v3  ;;  %320 = vperm.xlu0 %1381, %v298_v10   ;;  %v1392_v22 = vld [vmem:[#allocation2 + $0x8] sm:$0xff]   ;;  %v1404_v26 = vld [vmem:[%s1868_s3 + $0x10] sm:$0xff]   ;;  %v308_v29 = vld [vmem:[%s1866_s1 + $0x58] sm:$0xff] }
  0x41   :  { %1260 = vmatpush3.bf16.msra.mxu1 %v1400_v17  ;;  %v306_v24 = vld [vmem:[%s1866_s1 + $0x48] sm:$0xff]  ;;  %v1393_v27 = vld [vmem:[#allocation2 + $0x10] sm:$0xff]   ;;  %v1405_v30 = vld [vmem:[%s1868_s3 + $0x58] sm:$0xff]  }
  0x42   :  { %1261 = vmatprep.subr.bf16.mxu1 %v1401_v20  ;;  %v307_v28 = vld [vmem:[%s1866_s1 + $0x50] sm:$0xff]  ;;  %v1406_v31 = vld [vmem:[%s1868_s3 + $0x18] sm:$0xff]   ;;  %v309_v33 = vld [vmem:[%s1866_s1 + $0x60] sm:$0xff] }
  0x43   :  { %1328 = vmatpush3.bf16.msra.mxu0 %v1385_v3  ;;  %340 = vperm.xlu1 %1382, %v302_v14   ;;  %v1394_v32 = vld [vmem:[#allocation2 + $0x18] sm:$0xff]   ;;  %v310_v34 = vld [vmem:[%s1866_s1 + $0x68] sm:$0xff]  ;;  %v1407_v35 = vld [vmem:[%s1868_s3 + $0x60] sm:$0xff]  }
  0x44   :  { %1329 = vmatprep.subr.bf16.mxu0 %v1386_v4  ;;  %335 = vperm.xlu0 %1381, %v301_v13   ;;  %v1408_v36 = vld [vmem:[%s1868_s3 + $0x20] sm:$0xff]   ;;  %v311_v38 = vld [vmem:[%s1866_s1 + $0x70] sm:$0xff]  ;;  %v312_v39 = vld [vmem:[%s1866_s1 + $0x78] sm:$0xff] }
  0x45   :  { %1262 = vmatpush3.bf16.msra.mxu1 %v1402_v21  ;;  %v1395_v37 = vld [vmem:[#allocation2 + $0x20] sm:$0xff]   ;;  %v1409_v40 = vld [vmem:[%s1868_s3 + $0x68] sm:$0xff]   ;;  %v1397_v43 = vld [vmem:[#allocation2 + $0x30] sm:$0xff]  }
  0x46   :  { %1263 = vmatprep.subr.bf16.mxu1 %v1403_v25  ;;  %v1410_v41 = vld [vmem:[%s1868_s3 + $0x28] sm:$0xff]   ;;  %v1398_v44 = vld [vmem:[#allocation2 + $0x38] sm:$0xff]   ;;  %v1411_v45 = vld [vmem:[%s1868_s3 + $0x70] sm:$0xff]  }
  0x47   :  { %1330 = vmatpush3.bf16.msra.mxu0 %v1386_v4  ;;  %350 = vperm.xlu1 %1382, %v304_v19   ;;  %v1396_v42 = vld [vmem:[#allocation2 + $0x28] sm:$0xff]   ;;  %v1412_v46 = vld [vmem:[%s1868_s3 + $0x30] sm:$0xff]   ;;  %v1413_v47 = vld [vmem:[%s1868_s3 + $0x78] sm:$0xff]  }
  0x48   :  { %1331 = vmatprep.subr.bf16.mxu0 %v1387_v6  ;;  %345 = vperm.xlu0 %1381, %v303_v18   ;;  %v1414_v48 = vld [vmem:[%s1868_s3 + $0x38] sm:$0xff]   ;;  %v1415_v49 = vld [vmem:[#allocation5] sm:$0xff]   ;;  %v1416_v14 = vld [vmem:[#allocation5 + $0x8] sm:$0xff]  }
  0x49   :  { %1264 = vmatpush3.bf16.msra.mxu1 %v1404_v26  ;;  %653 = vmatprep.mubr.bf16.mxu1 %v1415_v49  ;;  %v1423_v50 = vld [vmem:[#allocation7] ss:$8 sps:$4 sm:$0xff]   ;;  %v1425_v51 = vld [vmem:[#allocation7 + $0x4] ss:$8 sps:$4 sm:$0xff]   ;;  %v1428_v52 = vld [vmem:[#allocation7 + $0x14] ss:$8 sps:$4 sm:$0xff]  }
  0x4a   :  { %1265 = vmatprep.subr.bf16.mxu1 %v1405_v30  ;;  %v1426_v53 = vld [vmem:[#allocation7 + $0x10] ss:$8 sps:$4 sm:$0xff]   ;;  %v1431_v54 = vld [vmem:[#allocation7 + $0x24] ss:$8 sps:$4 sm:$0xff]   ;;  %v1429_v55 = vld [vmem:[#allocation7 + $0x20] ss:$8 sps:$4 sm:$0xff]  }
  0x4b   :  { %1332 = vmatpush3.bf16.msra.mxu0 %v1387_v6  ;;  %360 = vperm.xlu1 %1382, %v306_v24   ;;  %v1434_v56 = vld [vmem:[#allocation7 + $0x34] ss:$8 sps:$4 sm:$0xff]   ;;  %v1432_v57 = vld [vmem:[#allocation7 + $0x30] ss:$8 sps:$4 sm:$0xff]   ;;  %v1771_v58 = vld [vmem:[#allocation7 + $0x44] ss:$8 sps:$4 sm:$0xff]  }
  0x4c   :  { %1333 = vmatprep.subr.bf16.mxu0 %v1388_v7  ;;  %355 = vperm.xlu0 %1381, %v305_v23   ;;  %v1773_v59 = vld [vmem:[#allocation7 + $0x40] ss:$8 sps:$4 sm:$0xff]  }
  0x4d   :  { %1266 = vmatpush3.bf16.msra.mxu1 %v1406_v31 }
  0x4e   :  { %1267 = vmatprep.subr.bf16.mxu1 %v1407_v35 }
  0x4f   :  { %1334 = vmatpush3.bf16.msra.mxu0 %v1388_v7  ;;  %370 = vperm.xlu1 %1382, %v308_v29  }
  0x50   :  { %1335 = vmatprep.subr.bf16.mxu0 %v1389_v12  ;;  %365 = vperm.xlu0 %1381, %v307_v28   ;;  %v1417_v28 = vld [vmem:[#allocation5 + $0x10] sm:$0xff]  }
  0x51   :  { %1268 = vmatpush3.bf16.msra.mxu1 %v1408_v36 }
  0x52   :  { %1269 = vmatprep.subr.bf16.mxu1 %v1409_v40 }
  0x53   :  { %1336 = vmatpush3.bf16.msra.mxu0 %v1389_v12  ;;  %380 = vperm.xlu1 %1382, %v310_v34  }
  0x54   :  { %1337 = vmatprep.subr.bf16.mxu0 %v1390_v15  ;;  %375 = vperm.xlu0 %1381, %v309_v33  }
  0x55   :  { %1270 = vmatpush3.bf16.msra.mxu1 %v1410_v41 }
  0x56   :  { %1271 = vmatprep.subr.bf16.mxu1 %v1411_v45 }
  0x57   :  { %1338 = vmatpush3.bf16.msra.mxu0 %v1390_v15  ;;  %390 = vperm.xlu1 %1382, %v312_v39  }
  0x58   :  { %385 = vperm.xlu0 %1381, %v311_v38   ;;  %838 = vmatprep.subr.bf16.mxu0 %v1425_v51 }
  0x59   :  { %1272 = vmatpush3.bf16.msra.mxu1 %v1412_v46 }
  0x5a   :  { %1340 = vmatmul.mubr.bf16.vlgmr.msra.gmra.mrb[0].mxu0 %v1392_v22  ;;  %1273 = vmatprep.subr.bf16.mxu1 %v1413_v47 }
  0x5b   :  { %1343 = vmatprep.mubr.bf16.mxu0 %v1393_v27  ;;  %839 = vmatpush1.bf16.msra.mxu0 %v1423_v50 }
  0x5c   :  { %840 = vmatprep.subr.bf16.mxu0 %v1428_v52 }
  0x5d   :  { %1274 = vmatpush3.bf16.msra.mxu1 %v1414_v48 }
  0x5e   :  { %1355 = vmatprep.subr.bf16.mxu1 %v1425_v51 }
  0x5f   :  { %841 = vmatpush1.bf16.msra.mxu0 %v1426_v53 }
  0x60   :  { %842 = vmatprep.subr.bf16.mxu0 %v1431_v54 }
  0x62   :  { %1344 = vmatmul.mubr.bf16.gmra.mrb[4].mxu0 %v1394_v32 }
  0x63   :  { %1347 = vmatprep.mubr.bf16.mxu0 %v1395_v37  ;;  %843 = vmatpush1.bf16.msra.mxu0 %v1429_v55 }
  0x64   :  { %844 = vmatprep.subr.bf16.mxu0 %v1434_v56 }
  0x67   :  { %845 = vmatpush1.bf16.msra.mxu0 %v1432_v57 }
  0x68   :  { %846 = vmatprep.subr.bf16.mxu0 %v1771_v58 }
  0x6a   :  { %1348 = vmatmul.mubr.bf16.gmra.mrb[8].mxu0 %v1396_v42  ;;  %v1418_v42 = vld [vmem:[#allocation5 + $0x18] sm:$0xff]  }
  0x6b   :  { %1351 = vmatprep.mubr.bf16.mxu0 %v1397_v43  ;;  %847 = vmatpush1.bf16.msra.mxu0 %v1773_v59 }
  0x72   :  { %1352 = vmatmul.mubr.bf16.gmra.mrb[12].mxu0 %v1398_v44 }
  0x73   :  { %870 = vmatprep.mubr.bf16.mxu0 %v1572_v0 }
  0xba   :  { %v326_v61 = vpop.permute.xlu1 %325 }
  0xbb   :  { %v316_v60 = vpop.permute.xlu0 %315 }
  0xbe   :  { %v331_v63 = vpop.permute.xlu1 %330 }
  0xbf   :  { %v321_v62 = vpop.permute.xlu0 %320 }
  0xc2   :  { %v341_v2 = vpop.permute.xlu1 %340 }
  0xc3   :  { %v336_v1 = vpop.permute.xlu0 %335 }
  0xc6   :  { %v351_v6 = vpop.permute.xlu1 %350 }
  0xc7   :  { %v346_v4 = vpop.permute.xlu0 %345 }
  0xca   :  { %v361_v17 = vpop.permute.xlu1 %360 }
  0xcb   :  { %v356_v16 = vpop.permute.xlu0 %355 }
  0xce   :  { %v371_v29 = vpop.permute.xlu1 %370 }
  0xcf   :  { %v366_v26 = vpop.permute.xlu0 %365 }
  0xd2   :  { %v381_v38 = vpop.permute.xlu1 %380 }
  0xd3   :  { %v376_v34 = vpop.permute.xlu0 %375 }
  0xd6   :  { %v391_v47 = vpop.permute.xlu1 %390 }
  0xd7   :  { %v386_v45 = vpop.permute.xlu0 %385 }
 0x12d   :  { %v1341_v3 = vpop.f32.mrb[0].mxu0 }
 0x12e   :  { %v234_v5 = vpop.f32.mrb[1].mxu0  ;;  %v395_v8 = vmul.f32 %v1341_v3, %v326_v61  ;;  %v1438_v61 = vld [vmem:[#allocation7 + $0x50] ss:$8 sps:$4 sm:$0xff]  }
 0x12f   :  { %v1342_v7 = vpop.f32.mrb[2].mxu0  ;;  %v393_v11 = vmul.f32 %v316_v60, %v234_v5  ;;  %v1422_v60 = vld [vmem:[#allocation5 + $0x38] sm:$0xff]  }
 0x130   :  { %v396_v9 = vmul.f32 %v1342_v7, %v331_v63  ;;  %v237_v10 = vpop.f32.mrb[3].mxu0  ;;  %v1441_v63 = vld [vmem:[#allocation7 + $0x60] ss:$8 sps:$4 sm:$0xff]  }
 0x131   :  { %v394_v12 = vmul.f32 %v321_v62, %v237_v10  ;;  %v1443_v62 = vld [vmem:[#allocation7 + $0x64] ss:$8 sps:$4 sm:$0xff]  }
 0x132   :  { %v431_v13 = vpack.c.bf16 %v396_v9, %v395_v8 }
 0x133   :  { %v430_v15 = vpack.c.bf16 %v394_v12, %v393_v11 }
 0x135   :  { %v1345_v18 = vpop.f32.mrb[4].mxu0  ;;  %654 = vmatmul.mubr.bf16.vlgmr.msra.gmra.mrb[0].mxu1 %v430_v15 }
 0x136   :  { %v250_v19 = vpop.f32.mrb[5].mxu0  ;;  %661 = vmatprep.mubr.bf16.mxu1 %v1416_v14  ;;  %1363 = vmatpush1.bf16.msra.mxu1 %v1423_v50  ;;  %v399_v21 = vmul.f32 %v1345_v18, %v346_v4  ;;  %v1783_v4 = vld [vmem:[%s1869_s4] ss:$0 sm:$0xff] }
 0x137   :  { %v1346_v20 = vpop.f32.mrb[6].mxu0  ;;  %1356 = vmatprep.subr.bf16.mxu1 %v1428_v52  ;;  %v397_v24 = vmul.f32 %v336_v1, %v250_v19  ;;  %v1446_v1 = vld [vmem:[#allocation7 + $0x74] ss:$8 sps:$4 sm:$0xff]  }
 0x138   :  { %v400_v22 = vmul.f32 %v1346_v20, %v351_v6  ;;  %v253_v23 = vpop.f32.mrb[7].mxu0 }
 0x139   :  { %v398_v25 = vmul.f32 %v341_v2, %v253_v23  ;;  %v1444_v2 = vld [vmem:[#allocation7 + $0x70] ss:$8 sps:$4 sm:$0xff]  }
 0x13a   :  { %v433_v27 = vpack.c.bf16 %v400_v22, %v399_v21  ;;  %1364 = vmatpush1.bf16.msra.mxu1 %v1426_v53 }
 0x13b   :  { %v432_v30 = vpack.c.bf16 %v398_v25, %v397_v24  ;;  %1357 = vmatprep.subr.bf16.mxu1 %v1431_v54 }
 0x13d   :  { %v1349_v31 = vpop.f32.mrb[8].mxu0  ;;  %662 = vmatmul.mubr.bf16.gmra.mrb[4].mxu1 %v431_v13 }
 0x13e   :  { %v266_v32 = vpop.f32.mrb[9].mxu0  ;;  %669 = vmatprep.mubr.bf16.mxu1 %v1417_v28  ;;  %1365 = vmatpush1.bf16.msra.mxu1 %v1429_v55  ;;  %v403_v35 = vmul.f32 %v1349_v31, %v366_v26  ;;  %v1419_v55 = vld [vmem:[#allocation5 + $0x20] sm:$0xff]  }
 0x13f   :  { %v1350_v33 = vpop.f32.mrb[10].mxu0  ;;  %1358 = vmatprep.subr.bf16.mxu1 %v1434_v56  ;;  %v401_v39 = vmul.f32 %v356_v16, %v266_v32 }
 0x140   :  { %v404_v36 = vmul.f32 %v1350_v33, %v371_v29  ;;  %v269_v37 = vpop.f32.mrb[11].mxu0 }
 0x141   :  { %v402_v40 = vmul.f32 %v361_v17, %v269_v37 }
 0x142   :  { %v435_v41 = vpack.c.bf16 %v404_v36, %v403_v35  ;;  %1366 = vmatpush1.bf16.msra.mxu1 %v1432_v57  ;;  %v1420_v57 = vld [vmem:[#allocation5 + $0x28] sm:$0xff]  }
 0x143   :  { %v434_v43 = vpack.c.bf16 %v402_v40, %v401_v39  ;;  %1359 = vmatprep.subr.bf16.mxu1 %v1771_v58  ;;  %v1421_v58 = vld [vmem:[#allocation5 + $0x30] sm:$0xff]  }
 0x145   :  { %v1353_v44 = vpop.f32.mrb[12].mxu0  ;;  %670 = vmatmul.mubr.bf16.gmra.mrb[8].mxu1 %v432_v30 }
 0x146   :  { %v282_v46 = vpop.f32.mrb[13].mxu0  ;;  %677 = vmatprep.mubr.bf16.mxu1 %v1418_v42  ;;  %1367 = vmatpush1.bf16.msra.mxu1 %v1773_v59  ;;  %v407_v49 = vmul.f32 %v1353_v44, %v386_v45  ;;  %v1440_v59 = vld [vmem:[#allocation7 + $0x54] ss:$8 sps:$4 sm:$0xff]  }
 0x147   :  { %v1354_v48 = vpop.f32.mrb[14].mxu0  ;;  %v405_v52 = vmul.f32 %v376_v34, %v282_v46  ;;  %848 = vmatprep.subr.bf16.mxu0 %v1440_v59  ;;  %1360 = vmatprep.subr.bf16.mxu1 %v1440_v59 }
 0x148   :  { %v408_v50 = vmul.f32 %v1354_v48, %v391_v47  ;;  %v285_v51 = vpop.f32.mrb[15].mxu0  ;;  %849 = vmatpush1.bf16.msra.mxu0 %v1438_v61 }
 0x149   :  { %v406_v53 = vmul.f32 %v381_v38, %v285_v51  ;;  %850 = vmatprep.subr.bf16.mxu0 %v1443_v62 }
 0x14a   :  { %v437_v54 = vpack.c.bf16 %v408_v50, %v407_v49  ;;  %1368 = vmatpush1.bf16.msra.mxu1 %v1438_v61 }
 0x14b   :  { %v436_v56 = vpack.c.bf16 %v406_v53, %v405_v52  ;;  %1361 = vmatprep.subr.bf16.mxu1 %v1443_v62 }
 0x14c   :  { %851 = vmatpush1.bf16.msra.mxu0 %v1441_v63 }
 0x14d   :  { %678 = vmatmul.mubr.bf16.gmra.mrb[12].mxu1 %v433_v27  ;;  %852 = vmatprep.subr.bf16.mxu0 %v1446_v1 }
 0x14e   :  { %685 = vmatprep.mubr.bf16.mxu1 %v1419_v55  ;;  %1369 = vmatpush1.bf16.msra.mxu1 %v1441_v63 }
 0x14f   :  { %1362 = vmatprep.subr.bf16.mxu1 %v1446_v1 }
 0x150   :  { %853 = vmatpush1.bf16.msra.mxu0 %v1444_v2 }
 0x152   :  { %1370 = vmatpush1.bf16.msra.mxu1 %v1444_v2 }
 0x155   :  { %686 = vmatmul.mubr.bf16.gmra.mrb[16].mxu1 %v434_v43 }
 0x156   :  { %693 = vmatprep.mubr.bf16.mxu1 %v1420_v57 }
 0x15d   :  { %694 = vmatmul.mubr.bf16.gmra.mrb[20].mxu1 %v435_v41 }
 0x15e   :  { %701 = vmatprep.mubr.bf16.mxu1 %v1421_v58 }
 0x165   :  { %702 = vmatmul.mubr.bf16.gmra.mrb[24].mxu1 %v436_v56 }
 0x166   :  { %709 = vmatprep.mubr.bf16.mxu1 %v1422_v60 }
 0x16d   :  { %710 = vmatmul.mubr.bf16.gmra.mrb[28].mxu1 %v437_v54 }
 0x16e   :  { %930 = vmatprep.mubr.bf16.mxu1 %v1572_v0 }
 0x208   :  { %v1275_v3 = vpop.f32.mrb[0].mxu1 }
 0x209   :  { %v1276_v5 = vpop.f32.mrb[1].mxu1 }
 0x20a   :  { %v1277_v6 = vadd.f32 %v1276_v5, %v1275_v3  ;;  %v1278_v7 = vpop.f32.mrb[2].mxu1 }
 0x20b   :  { %v1279_v8 = vpop.f32.mrb[3].mxu1 }
 0x20c   :  { %v656_v9 = vadd.f32 %v1277_v6, %v1783_v4  ;;  %v1280_v10 = vadd.f32 %v1279_v8, %v1278_v7 }
 0x20e   :  { %v659_v11 = vadd.f32 %v1280_v10, %v1783_v4  ;;  %v718_v12 = vmax.f32 %v656_v9, 0.0 }
 0x210   :  { %v719_v13 = vmax.f32 %v659_v11, 0.0  ;;  %v1281_v14 = vpop.f32.mrb[4].mxu1 }
 0x211   :  { %v1282_v15 = vpop.f32.mrb[5].mxu1 }
 0x212   :  { %v734_v16 = vpack.c.bf16 %v719_v13, %v718_v12  ;;  %v1283_v17 = vadd.f32 %v1282_v15, %v1281_v14  ;;  %v1284_v18 = vpop.f32.mrb[6].mxu1 }
 0x213   :  { %v1285_v19 = vpop.f32.mrb[7].mxu1 }
 0x214   :  { %v664_v20 = vadd.f32 %v1283_v17, %v1783_v4  ;;  %v1286_v21 = vadd.f32 %v1285_v19, %v1284_v18  ;;  %871 = vmatmul.mubr.bf16.vlgmr.msra.gmra.mrb[16].mxu0 %v734_v16 }
 0x215   :  { %880 = vmatprep.mubr.bf16.mxu0 %v1572_v0 }
 0x216   :  { %v667_v22 = vadd.f32 %v1286_v21, %v1783_v4  ;;  %v720_v23 = vmax.f32 %v664_v20, 0.0 }
 0x218   :  { %v721_v24 = vmax.f32 %v667_v22, 0.0  ;;  %v1287_v25 = vpop.f32.mrb[8].mxu1 }
 0x219   :  { %v1288_v26 = vpop.f32.mrb[9].mxu1 }
 0x21a   :  { %v1289_v27 = vadd.f32 %v1288_v26, %v1287_v25  ;;  %v1290_v28 = vpop.f32.mrb[10].mxu1  ;;  %v735_v29 = vpack.c.bf16 %v721_v24, %v720_v23 }
 0x21b   :  { %v1291_v30 = vpop.f32.mrb[11].mxu1 }
 0x21c   :  { %v672_v31 = vadd.f32 %v1289_v27, %v1783_v4  ;;  %v1292_v32 = vadd.f32 %v1291_v30, %v1290_v28  ;;  %881 = vmatmul.mubr.bf16.gmra.mrb[20].mxu0 %v735_v29  ;;  %v1810_v30 = vld [vmem:[%s1871_s6] ss:$0 sm:$0xff]  ;;  %s1573_s6 = smov [#allocation8]  }
 0x21d   :  { %890 = vmatprep.mubr.bf16.mxu0 %v1572_v0  ;;  %s1075_s24 = sshll.u32 %s1573_s6, 4  ;;  %s1076_s24 = int_to_ptr.vmem [resolvable:$true] %s1075_s24 }
 0x21e   :  { %v675_v33 = vadd.f32 %v1292_v32, %v1783_v4  ;;  %v722_v34 = vmax.f32 %v672_v31, 0.0  ;;  %s1513_s27 = scalar_lea.vmem %s1076_s24, 1024  ;;  %p1518_p11 = scmp.lt.s32.totalorder %s1076_s24, %s1076_s24 }
 0x21f   :  { %p1514_p10 = scmp.ne.s32.totalorder %s1076_s24, %s1513_s27  ;;  %p1519_p12 = scmp.lt.s32.totalorder %s1513_s27, %s1513_s27 }
 0x220   :  { %v723_v35 = vmax.f32 %v675_v33, 0.0  ;;  %v1293_v36 = vpop.f32.mrb[12].mxu1 }
 0x221   :  { %v1294_v37 = vpop.f32.mrb[13].mxu1  ;;  %p1520_p13 = por %p1519_p12, %p1518_p11 }
 0x222   :  { %v1295_v38 = vadd.f32 %v1294_v37, %v1293_v36  ;;  %v1296_v39 = vpop.f32.mrb[14].mxu1  ;;  %v736_v40 = vpack.c.bf16 %v723_v35, %v722_v34 }
 0x223   :  { %v1297_v41 = vpop.f32.mrb[15].mxu1  ;;  %p1521_p0 = pnand %p1520_p13, %p1514_p10 }
 0x224   :  { %v680_v42 = vadd.f32 %v1295_v38, %v1783_v4  ;;  %v1298_v43 = vadd.f32 %v1297_v41, %v1296_v39  ;;  %891 = vmatmul.mubr.bf16.gmra.mrb[24].mxu0 %v736_v40 }
 0x225   :  { %900 = vmatprep.mubr.bf16.mxu0 %v1572_v0 }
 0x226   :  { %v683_v44 = vadd.f32 %v1298_v43, %v1783_v4  ;;  %v724_v45 = vmax.f32 %v680_v42, 0.0 }
 0x228   :  { %v725_v46 = vmax.f32 %v683_v44, 0.0  ;;  %v1299_v47 = vpop.f32.mrb[16].mxu1 }
 0x229   :  { %v1300_v48 = vpop.f32.mrb[17].mxu1 }
 0x22a   :  { %v1301_v49 = vadd.f32 %v1300_v48, %v1299_v47  ;;  %v1302_v50 = vpop.f32.mrb[18].mxu1  ;;  %v737_v51 = vpack.c.bf16 %v725_v46, %v724_v45 }
 0x22b   :  { %v1303_v52 = vpop.f32.mrb[19].mxu1 }
 0x22c   :  { %v688_v53 = vadd.f32 %v1301_v49, %v1783_v4  ;;  %v1304_v54 = vadd.f32 %v1303_v52, %v1302_v50  ;;  %901 = vmatmul.mubr.bf16.gmra.mrb[28].mxu0 %v737_v51 }
 0x22d   :  { %910 = vmatprep.mubr.bf16.mxu0 %v1572_v0 }
 0x22e   :  { %v691_v55 = vadd.f32 %v1304_v54, %v1783_v4  ;;  %v726_v56 = vmax.f32 %v688_v53, 0.0 }
 0x230   :  { %v727_v57 = vmax.f32 %v691_v55, 0.0  ;;  %v1305_v58 = vpop.f32.mrb[20].mxu1 }
 0x231   :  { %v1306_v60 = vpop.f32.mrb[21].mxu1 }
 0x232   :  { %v1307_v59 = vadd.f32 %v1306_v60, %v1305_v58  ;;  %v1308_v61 = vpop.f32.mrb[22].mxu1  ;;  %v738_v62 = vpack.c.bf16 %v727_v57, %v726_v56 }
 0x233   :  { %v1309_v63 = vpop.f32.mrb[23].mxu1 }
 0x234   :  { %v696_v1 = vadd.f32 %v1307_v59, %v1783_v4  ;;  %v1310_v2 = vadd.f32 %v1309_v63, %v1308_v61  ;;  %911 = vmatmul.mubr.bf16.gmra.mrb[32].mxu0 %v738_v62 }
 0x235   :  { %920 = vmatprep.mubr.bf16.mxu0 %v1572_v0 }
 0x236   :  { %v699_v3 = vadd.f32 %v1310_v2, %v1783_v4  ;;  %v728_v5 = vmax.f32 %v696_v1, 0.0 }
 0x238   :  { %v729_v6 = vmax.f32 %v699_v3, 0.0  ;;  %v1311_v7 = vpop.f32.mrb[24].mxu1 }
 0x239   :  { %v1312_v8 = vpop.f32.mrb[25].mxu1 }
 0x23a   :  { %v1313_v9 = vadd.f32 %v1312_v8, %v1311_v7  ;;  %v1314_v10 = vpop.f32.mrb[26].mxu1  ;;  %v739_v11 = vpack.c.bf16 %v729_v6, %v728_v5 }
 0x23b   :  { %v1315_v12 = vpop.f32.mrb[27].mxu1 }
 0x23c   :  { %v704_v13 = vadd.f32 %v1313_v9, %v1783_v4  ;;  %v1316_v14 = vadd.f32 %v1315_v12, %v1314_v10  ;;  %921 = vmatmul.mubr.bf16.gmra.mrb[36].mxu0 %v739_v11 }
 0x23e   :  { %v707_v15 = vadd.f32 %v1316_v14, %v1783_v4  ;;  %v730_v16 = vmax.f32 %v704_v13, 0.0 }
 0x240   :  { %v731_v17 = vmax.f32 %v707_v15, 0.0  ;;  %v1317_v18 = vpop.f32.mrb[28].mxu1 }
 0x241   :  { %v1318_v19 = vpop.f32.mrb[29].mxu1 }
 0x242   :  { %v740_v20 = vpack.c.bf16 %v731_v17, %v730_v16  ;;  %v1319_v21 = vadd.f32 %v1318_v19, %v1317_v18  ;;  %v1320_v22 = vpop.f32.mrb[30].mxu1 }
 0x243   :  { %v1321_v23 = vpop.f32.mrb[31].mxu1 }
 0x244   :  { %v712_v24 = vadd.f32 %v1319_v21, %v1783_v4  ;;  %v1322_v25 = vadd.f32 %v1321_v23, %v1320_v22  ;;  %931 = vmatmul.mubr.bf16.vlgmr.msra.gmra.mrb[32].mxu1 %v740_v20 }
 0x245   :  { %940 = vmatprep.mubr.bf16.mxu1 %v1572_v0 }
 0x246   :  { %v715_v26 = vadd.f32 %v1322_v25, %v1783_v4  ;;  %v732_v27 = vmax.f32 %v712_v24, 0.0 }
 0x248   :  { %v733_v28 = vmax.f32 %v715_v26, 0.0 }
 0x24a   :  { %v741_v29 = vpack.c.bf16 %v733_v28, %v732_v27 }
 0x24c   :  { %941 = vmatmul.mubr.bf16.gmra.mrb[36].mxu1 %v741_v29 }
 0x2e7   :  { %v872_v31 = vpop.f32.mrb[16].mxu0 }
 0x2e8   :  { %v874_v32 = vpop.f32.mrb[17].mxu0 }
 0x2e9   :  { %v1038_v33 = vadd.f32 %v1810_v30, %v874_v32  ;;  %v876_v34 = vpop.f32.mrb[18].mxu0 }
 0x2ea   :  { %v1199_v35 = vpack.c.bf16 %v876_v34, %v872_v31  ;;  %v878_v36 = vpop.f32.mrb[19].mxu0 }
 0x2eb   :  { %1054 = vst [vmem:[#allocation9] sm:$0xff] %v1038_v33  ;;  %v1039_v0 = vadd.f32 %v1810_v30, %v878_v36 }
 0x2ec   :  { %1200 = vst [vmem:[#allocation8] sm:$0xff] %v1199_v35  }
 0x2ed   :  { %1055 = vst [vmem:[#allocation9 + $0x8] sm:$0xff] %v1039_v0 }
 0x2ef   :  { %v882_v4 = vpop.f32.mrb[20].mxu0 }
 0x2f0   :  { %v884_v37 = vpop.f32.mrb[21].mxu0 }
 0x2f1   :  { %v1040_v38 = vadd.f32 %v1810_v30, %v884_v37  ;;  %v886_v39 = vpop.f32.mrb[22].mxu0 }
 0x2f2   :  { %v1204_v40 = vpack.c.bf16 %v886_v39, %v882_v4  ;;  %v888_v41 = vpop.f32.mrb[23].mxu0 }
 0x2f3   :  { %1056 = vst [vmem:[#allocation9 + $0x10] sm:$0xff] %v1040_v38  ;;  %v1041_v42 = vadd.f32 %v1810_v30, %v888_v41 }
 0x2f4   :  { %1236 = vst [vmem:[#allocation8 + $0x8] sm:$0xff] %v1204_v40  }
 0x2f5   :  { %1057 = vst [vmem:[#allocation9 + $0x18] sm:$0xff] %v1041_v42 }
 0x2f7   :  { %v892_v43 = vpop.f32.mrb[24].mxu0 }
 0x2f8   :  { %v894_v44 = vpop.f32.mrb[25].mxu0 }
 0x2f9   :  { %v1042_v45 = vadd.f32 %v1810_v30, %v894_v44  ;;  %v896_v46 = vpop.f32.mrb[26].mxu0 }
 0x2fa   :  { %v1209_v47 = vpack.c.bf16 %v896_v46, %v892_v43  ;;  %v898_v48 = vpop.f32.mrb[27].mxu0 }
 0x2fb   :  { %1058 = vst [vmem:[#allocation9 + $0x20] sm:$0xff] %v1042_v45  ;;  %v1043_v49 = vadd.f32 %v1810_v30, %v898_v48 }
 0x2fc   :  { %1237 = vst [vmem:[#allocation8 + $0x10] sm:$0xff] %v1209_v47  }
 0x2fd   :  { %1059 = vst [vmem:[#allocation9 + $0x28] sm:$0xff] %v1043_v49 }
 0x2ff   :  { %v902_v50 = vpop.f32.mrb[28].mxu0 }
 0x300   :  { %v904_v51 = vpop.f32.mrb[29].mxu0 }
 0x301   :  { %v1044_v52 = vadd.f32 %v1810_v30, %v904_v51  ;;  %v906_v53 = vpop.f32.mrb[30].mxu0 }
 0x302   :  { %v1214_v54 = vpack.c.bf16 %v906_v53, %v902_v50  ;;  %v908_v55 = vpop.f32.mrb[31].mxu0 }
 0x303   :  { %1060 = vst [vmem:[#allocation9 + $0x30] sm:$0xff] %v1044_v52  ;;  %v1045_v56 = vadd.f32 %v1810_v30, %v908_v55 }
 0x304   :  { %1238 = vst [vmem:[#allocation8 + $0x18] sm:$0xff] %v1214_v54  }
 0x305   :  { %1061 = vst [vmem:[#allocation9 + $0x38] sm:$0xff] %v1045_v56 }
 0x307   :  { %v912_v57 = vpop.f32.mrb[32].mxu0 }
 0x308   :  { %v914_v58 = vpop.f32.mrb[33].mxu0 }
 0x309   :  { %v1046_v60 = vadd.f32 %v1810_v30, %v914_v58  ;;  %v916_v59 = vpop.f32.mrb[34].mxu0 }
 0x30a   :  { %v1219_v61 = vpack.c.bf16 %v916_v59, %v912_v57  ;;  %v918_v62 = vpop.f32.mrb[35].mxu0 }
 0x30b   :  { %1062 = vst [vmem:[#allocation9 + $0x40] sm:$0xff] %v1046_v60  ;;  %v1047_v63 = vadd.f32 %v1810_v30, %v918_v62 }
 0x30c   :  { %1239 = vst [vmem:[#allocation8 + $0x20] sm:$0xff] %v1219_v61  }
 0x30d   :  { %1063 = vst [vmem:[#allocation9 + $0x48] sm:$0xff] %v1047_v63 }
 0x30f   :  { %v922_v1 = vpop.f32.mrb[36].mxu0 }
 0x310   :  { %v924_v2 = vpop.f32.mrb[37].mxu0 }
 0x311   :  { %v1048_v3 = vadd.f32 %v1810_v30, %v924_v2  ;;  %v926_v5 = vpop.f32.mrb[38].mxu0 }
 0x312   :  { %v1224_v6 = vpack.c.bf16 %v926_v5, %v922_v1  ;;  %v928_v7 = vpop.f32.mrb[39].mxu0 }
 0x313   :  { %1064 = vst [vmem:[#allocation9 + $0x50] sm:$0xff] %v1048_v3  ;;  %v1049_v8 = vadd.f32 %v1810_v30, %v928_v7 }
 0x314   :  { %1240 = vst [vmem:[#allocation8 + $0x28] sm:$0xff] %v1224_v6  }
 0x315   :  { %1065 = vst [vmem:[#allocation9 + $0x58] sm:$0xff] %v1049_v8 }
 0x317   :  { %v932_v9 = vpop.f32.mrb[32].mxu1 }
 0x318   :  { %v934_v10 = vpop.f32.mrb[33].mxu1 }
 0x319   :  { %v1050_v11 = vadd.f32 %v1810_v30, %v934_v10  ;;  %v936_v12 = vpop.f32.mrb[34].mxu1 }
 0x31a   :  { %v1229_v13 = vpack.c.bf16 %v936_v12, %v932_v9  ;;  %v938_v14 = vpop.f32.mrb[35].mxu1 }
 0x31b   :  { %1066 = vst [vmem:[#allocation9 + $0x60] sm:$0xff] %v1050_v11  ;;  %v1051_v15 = vadd.f32 %v1810_v30, %v938_v14 }
 0x31c   :  { %1241 = vst [vmem:[#allocation8 + $0x30] sm:$0xff] %v1229_v13  }
 0x31d   :  { %1067 = vst [vmem:[#allocation9 + $0x68] sm:$0xff] %v1051_v15 }
 0x31f   :  { %v942_v16 = vpop.f32.mrb[36].mxu1 }
 0x320   :  { %v944_v17 = vpop.f32.mrb[37].mxu1 }
 0x321   :  { %v1052_v18 = vadd.f32 %v1810_v30, %v944_v17  ;;  %v946_v19 = vpop.f32.mrb[38].mxu1 }
 0x322   :  { %v1234_v20 = vpack.c.bf16 %v946_v19, %v942_v16  ;;  %v948_v21 = vpop.f32.mrb[39].mxu1 }
 0x323   :  { %1068 = vst [vmem:[#allocation9 + $0x70] sm:$0xff] %v1052_v18  ;;  %v1053_v22 = vadd.f32 %v1810_v30, %v948_v21 }
 0x324   :  { %1242 = vst [vmem:[#allocation8 + $0x38] sm:$0xff] %v1234_v20  }
 0x325   :  { %1069 = vst [vmem:[#allocation9 + $0x78] sm:$0xff] %v1053_v22 }
 0x326   :  { %1524 = shalt.err (!%p1521_p0)
}
 0x327   :  { %s1525_s28 = scalar_lea.hbm %s1872_s7, 1024 }
 0x328   :  { %p1526_p1 = scmp.ne.s32.totalorder %s1872_s7, %s1525_s28  ;;  %p1529_p2 = scmp.lt.u32.totalorder %s1525_s28, %s1872_s7 }
 0x32a   :  { %p1531_p3 = pnand %p1529_p2, %p1526_p1 }
 0x32c   :  { %1534 = shalt.err (!%p1531_p3)
}
 0x32d   :  { %1081 = dma.vmem_to_hbm [thread:$0]  %s1076_s24, 1024, %s1872_s7, [#allocation4], %s1567_s17, %s1567_s17, %s1568_s18  }
 0x32e   :  { %s1535_s14 = scalar_lea.vmem %s1828_s26, 2048  ;;  %p1540_p5 = scmp.lt.s32.totalorder %s1828_s26, %s1828_s26 }
 0x32f   :  { %p1536_p4 = scmp.ne.s32.totalorder %s1828_s26, %s1535_s14  ;;  %p1541_p6 = scmp.lt.s32.totalorder %s1535_s14, %s1535_s14 }
 0x331   :  { %p1542_p7 = por %p1541_p6, %p1540_p5 }
 0x333   :  { %p1543_p8 = pnand %p1542_p7, %p1536_p4 }
 0x335   :  { %1546 = shalt.err (!%p1543_p8)
}
 0x336   :  { %s1547_s19 = scalar_lea.hbm %s1873_s8, 2048 }
 0x337   :  { %p1548_p9 = scmp.ne.s32.totalorder %s1873_s8, %s1547_s19  ;;  %p1551_p10 = scmp.lt.u32.totalorder %s1547_s19, %s1873_s8 }
 0x339   :  { %p1553_p11 = pnand %p1551_p10, %p1548_p9 }
 0x33b   :  { %1556 = shalt.err (!%p1553_p11)
}
 0x33c   :  { %1093 = dma.vmem_to_hbm [thread:$0]  %s1828_s26, 2048, %s1873_s8, [#allocation10], %s1570_s0, %s1570_s0, %s1571_s30  }
 0x33d   :  { %1561 = dma.done.wait [#allocation4], 1024  }
 0x33e   :  { %1562 = vsyncadd [#allocation4], 4294966272 }
 0x33f   :  { %1563 = dma.done.wait [#allocation10], 2048  }
 0x340   :  { %1564 = vsyncadd [#allocation10], 4294965248 }
 0x341   :  { %1100 = vsyncpa [#allocation3], 1 }
 0x342   :  { %1101 = vsyncpa [#allocation6], 1 }
 0x343   :  { %1102 = vsyncpa [#allocation4], 1 }
 0x344   :  { %1103 = vsyncpa [#allocation10], 1 }

</bundles_post_ra>
